<compile_context>
chip_gen: v7x
topology: tpu7x:2x2x1
jax: 0.10.0
libtpu: 0.0.40
codegen_flags: <defaults>
</compile_context>

<pallas_src>
import jax
import jax.numpy as jnp
from jax.experimental import pallas as pl
from jax.experimental.pallas import tpu as pltpu

IN_FEATURES = 3
OUT_FEATURES = 4

# Lanes (batch elements) per grid step.  Multiple of 128.  Per-step VMEM:
# in (8 x TB x 4B after sublane padding) + out (8 x TB x 4B) = 2 MiB at 64K,
# ~4 MiB double-buffered -> fits every chip's scoped VMEM default.
DEFAULT_TILE_B = 65536

# If the whole batch fits in one tile but has at least this many rows, split it
# into two grid steps so v7x's two TensorCores both participate.
_MEGACORE_SPLIT_ROWS = 16384


def _round_up(n, m):
    return ((n + m - 1) // m) * m


def linear_kernel(xT_ref, w_ref, b_ref, oT_ref):
    # xT_ref: (3, TB)   == x^T block     (batch on lanes)
    # w_ref : (4, 3)    == W             (PyTorch layout, VMEM-resident)
    # b_ref : (4, 1)    == bias column   (broadcast over lanes)
    # oT_ref: (4, TB)   == y^T block
    xT = xT_ref[...].astype(jnp.float32)
    w = w_ref[...].astype(jnp.float32)
    b = b_ref[...].astype(jnp.float32)

    # Unrolled K=3 contraction as VPU broadcast-FMAs on (4, TB) tiles; bias is
    # folded into the first pass.  No MXU involvement for this tiny K.
    acc = w[:, 0:1] * xT[0:1, :] + b
    acc = acc + w[:, 1:2] * xT[1:2, :]
    acc = acc + w[:, 2:3] * xT[2:3, :]

    oT_ref[...] = acc.astype(oT_ref.dtype)


def linear_pallas(x, W, b, tile_b=DEFAULT_TILE_B):
    """y = x @ W^T + b, with x:(..., IN), W:(OUT, IN), b:(OUT,)."""
    orig_lead = x.shape[:-1]
    B = 1
    for d in orig_lead:
        B *= d

    x2 = x.reshape(B, IN_FEATURES)
    xT = x2.T                                # (3, B): batch on the lane axis
    b2 = b.reshape(OUT_FEATURES, 1)

    if B <= tile_b:
        if B >= _MEGACORE_SPLIT_ROWS:
            # Two grid steps so both v7x TensorCores get work.
            tb = _round_up(pl.cdiv(B, 2), 128)
        else:
            tb = B                           # single block == full array (legal)
    else:
        tb = tile_b                          # multiple of 128
    grid_b = pl.cdiv(B, tb)                  # ragged last block handled by Pallas

    yT = pl.pallas_call(
        linear_kernel,
        out_shape=jax.ShapeDtypeStruct((OUT_FEATURES, B), x.dtype),
        grid_spec=pl.GridSpec(
            grid=(grid_b,),
            in_specs=[
                pl.BlockSpec((IN_FEATURES, tb), lambda i: (0, i)),
                # Weight and bias: constant block index -> stay VMEM-resident.
                pl.BlockSpec((OUT_FEATURES, IN_FEATURES), lambda i: (0, 0)),
                pl.BlockSpec((OUT_FEATURES, 1), lambda i: (0, 0)),
            ],
            out_specs=pl.BlockSpec((OUT_FEATURES, tb), lambda i: (0, i)),
        ),
        compiler_params=pltpu.CompilerParams(
            dimension_semantics=("parallel",),
        ),
    )(xT, W, b2)

    y = yT.T                                 # (B, 4)
    return y.reshape(*orig_lead, OUT_FEATURES)


if __name__ == "__main__":
    key = jax.random.PRNGKey(0)
    k_x, k_w, k_b, k_x2 = jax.random.split(key, 4)

    # Deterministic parameter init (shapes per nn.Linear(3, 4)).
    W = jax.random.normal(k_w, (OUT_FEATURES, IN_FEATURES), dtype=jnp.float32) * 0.1
    bias = jax.random.normal(k_b, (OUT_FEATURES,), dtype=jnp.float32) * 0.1

    # Small example input: batch=8, in_features=3 (single-block path).
    x_small = jax.random.normal(k_x, (8, IN_FEATURES), dtype=jnp.float32)
    y_small = jax.block_until_ready(linear_pallas(x_small, W, bias))
    y_small_ref = x_small @ W.T + bias
    assert y_small.shape == (8, OUT_FEATURES)
    assert jnp.allclose(y_small, y_small_ref, atol=1e-5, rtol=1e-5)

    # Non-multiple batch with a small tile to exercise the multi-step grid and
    # the ragged (masked) last block.
    x_big = jax.random.normal(k_x2, (1040, IN_FEATURES), dtype=jnp.float32)
    y_big = jax.block_until_ready(linear_pallas(x_big, W, bias, tile_b=256))
    y_big_ref = x_big @ W.T + bias
    assert y_big.shape == (1040, OUT_FEATURES)
    assert jnp.allclose(y_big, y_big_ref, atol=1e-5, rtol=1e-5)

    print("KERNEL_OK")
</pallas_src>

<mosaic_0001>
module attributes {stable_mosaic.version = 11 : i64} {
  func.func @linear_kernel(%arg0: i32, %arg1: memref<3x8xf32, #tpu.memory_space<vmem>>, %arg2: memref<4x3xf32, #tpu.memory_space<vmem>>, %arg3: memref<4x1xf32, #tpu.memory_space<vmem>>, %arg4: memref<4x8xf32, #tpu.memory_space<vmem>>) attributes {dimension_semantics = [#tpu.dimension_semantics<parallel>], iteration_bounds = array<i64: 1>, scalar_prefetch = 0 : i64, scratch_operands = 0 : i64, tpu.core_type = #tpu.core_type<tc>, window_params = [{transform_indices = @transform_0, window_bounds = array<i64: 3, 8>}, {pipeline_mode = #tpu.pipeline_mode<synchronous>, transform_indices = @transform_1, window_bounds = array<i64: 4, 3>}, {pipeline_mode = #tpu.pipeline_mode<synchronous>, transform_indices = @transform_2, window_bounds = array<i64: 4, 1>}, {transform_indices = @transform_3, window_bounds = array<i64: 4, 8>}]} {
    %c0 = arith.constant 0 : index
    %c0_0 = arith.constant 0 : index
    %0 = vector.load %arg1[%c0, %c0_0] : memref<3x8xf32, #tpu.memory_space<vmem>>, vector<3x8xf32>
    %c0_1 = arith.constant 0 : index
    %c0_2 = arith.constant 0 : index
    %1 = vector.load %arg2[%c0_1, %c0_2] : memref<4x3xf32, #tpu.memory_space<vmem>>, vector<4x3xf32>
    %c0_3 = arith.constant 0 : index
    %c0_4 = arith.constant 0 : index
    %2 = vector.load %arg3[%c0_3, %c0_4] : memref<4x1xf32, #tpu.memory_space<vmem>>, vector<4x1xf32>
    %3 = vector.extract_strided_slice %1 {offsets = [0, 0], sizes = [4, 1], strides = [1, 1]} : vector<4x3xf32> to vector<4x1xf32>
    %4 = vector.extract_strided_slice %0 {offsets = [0, 0], sizes = [1, 8], strides = [1, 1]} : vector<3x8xf32> to vector<1x8xf32>
    %5 = vector.broadcast %3 : vector<4x1xf32> to vector<4x8xf32>
    %6 = vector.broadcast %4 : vector<1x8xf32> to vector<4x8xf32>
    %7 = arith.mulf %5, %6 : vector<4x8xf32>
    %8 = vector.broadcast %2 : vector<4x1xf32> to vector<4x8xf32>
    %9 = arith.addf %7, %8 : vector<4x8xf32>
    %10 = vector.extract_strided_slice %1 {offsets = [0, 1], sizes = [4, 1], strides = [1, 1]} : vector<4x3xf32> to vector<4x1xf32>
    %11 = vector.extract_strided_slice %0 {offsets = [1, 0], sizes = [1, 8], strides = [1, 1]} : vector<3x8xf32> to vector<1x8xf32>
    %12 = vector.broadcast %10 : vector<4x1xf32> to vector<4x8xf32>
    %13 = vector.broadcast %11 : vector<1x8xf32> to vector<4x8xf32>
    %14 = arith.mulf %12, %13 : vector<4x8xf32>
    %15 = arith.addf %9, %14 : vector<4x8xf32>
    %16 = vector.extract_strided_slice %1 {offsets = [0, 2], sizes = [4, 1], strides = [1, 1]} : vector<4x3xf32> to vector<4x1xf32>
    %17 = vector.extract_strided_slice %0 {offsets = [2, 0], sizes = [1, 8], strides = [1, 1]} : vector<3x8xf32> to vector<1x8xf32>
    %18 = vector.broadcast %16 : vector<4x1xf32> to vector<4x8xf32>
    %19 = vector.broadcast %17 : vector<1x8xf32> to vector<4x8xf32>
    %20 = arith.mulf %18, %19 : vector<4x8xf32>
    %21 = arith.addf %15, %20 : vector<4x8xf32>
    %c0_5 = arith.constant 0 : index
    %c0_6 = arith.constant 0 : index
    %22 = vector.load %arg4[%c0_5, %c0_6] : memref<4x8xf32, #tpu.memory_space<vmem>>, vector<4x8xf32>
    tpu.vector_store %arg4[%c0_5, %c0_6], %21 {strides = array<i32>} : memref<4x8xf32, #tpu.memory_space<vmem>>, vector<4x8xf32>,
    return
  }
  func.func @transform_0(%arg0: i32) -> (i32, i32) {
    %c0_i32 = arith.constant 0 : i32
    %c0_i32_0 = arith.constant 0 : i32
    return %c0_i32, %arg0 : i32, i32
  }
  func.func @transform_1(%arg0: i32) -> (i32, i32) {
    %c0_i32 = arith.constant 0 : i32
    %c0_i32_0 = arith.constant 0 : i32
    %c0_i32_1 = arith.constant 0 : i32
    return %c0_i32, %c0_i32_0 : i32, i32
  }
  func.func @transform_2(%arg0: i32) -> (i32, i32) {
    %c0_i32 = arith.constant 0 : i32
    %c0_i32_0 = arith.constant 0 : i32
    %c0_i32_1 = arith.constant 0 : i32
    return %c0_i32, %c0_i32_0 : i32, i32
  }
  func.func @transform_3(%arg0: i32) -> (i32, i32) {
    %c0_i32 = arith.constant 0 : i32
    %c0_i32_0 = arith.constant 0 : i32
    return %c0_i32, %arg0 : i32, i32
  }
}

</mosaic_0001>

<bundles_post_ra>
// kernel: tpu_custom_call.1
= control target key start
LH: loop header
LB: loop body
LE: loop exit
PB: predicated region body
PF: predicated region fallthrough
CT: control target
= control target key end

     0   :  { %v102_v1 = vmov 0   ;;  %v103_v2 = vmov 1   ;;  %s147_s0 = inlined_call_operand.vmem [shape: f32[3,8], index: 0, kind: input, shape index: {}]   ;;  %s148_s1 = inlined_call_operand.vmem [shape: f32[4,3], index: 1, kind: input, shape index: {}]   ;;  %s149_s2 = inlined_call_operand.vmem [shape: f32[4,1], index: 2, kind: input, shape index: {}]   ;;  %s150_s3 = inlined_call_operand.hbm [shape: f32[4,8], index: 3, kind: output, shape index: {}]  }
   0x1   :  { %v16_v0 = vld [vmem:[%s148_s1] sm:$0xf]  ;;  %74 = vset.pattern.permute.xlu0 %v102_v1  ;;  %75 = vset.pattern.permute.xlu1 %v103_v2 }
   0x2   :  { %8 = vsyncpa [#allocation3], 0  ;;  %20 = vperm.xlu0 %74, %v16_v0   ;;  %35 = vperm.xlu1 %75, %v16_v0   ;;  %v17_v3 = vld [vmem:[%s149_s2] sm:$0xf]  ;;  %v104_v4 = vmov 2   ;;  %v23_v5 = vlaneseq  ;;  %s105_s2 = smov [#allocation2]  }
   0x3   :  { %v15_v8 = vld [vmem:[%s147_s0] sm:$0x7]  ;;  %s62_s17 = sshll.u32 %s105_s2, 4  ;;  %vm54_vm0 = vcmask 60416   ;;  %s63_s17 = int_to_ptr.vmem [resolvable:$true] %s62_s17 }
   0x4   :  { %v24_v6 = vshrl.u32 %v23_v5, 7  ;;  %s78_s0 = scalar_lea.vmem %s63_s17, 64  ;;  %p83_p1 = scmp.lt.s32.totalorder %s63_s17, %s63_s17 }
   0x5   :  { %p79_p0 = scmp.ne.s32.totalorder %s63_s17, %s78_s0  ;;  %p84_p2 = scmp.lt.s32.totalorder %s78_s0, %s78_s0 }
   0x6   :  { %30 = vperm.xlu0 %74, %v17_v3   ;;  %76 = vset.pattern.permute.xlu1 %v104_v4  ;;  %v25_v7 = vsub.s32 0, %v24_v6  ;;  %v40_v9 = vsub.s32 1, %v24_v6  ;;  %v50_v10 = vsub.s32 2, %v24_v6 }
   0x7   :  { %45 = vperm.xlu1 %76, %v16_v0   ;;  %p85_p3 = por %p84_p2, %p83_p1 }
   0x8   :  { %v26_v11 = vrot.slane %v15_v8, %v25_v7  ;;  %v41_v14 = vrot.slane %v15_v8, %v40_v9  ;;  %v51_v15 = vrot.slane %v15_v8, %v50_v10 }
   0x9   :  { %p86_p4 = pnand %p85_p3, %p79_p0 }
   0xa   :  { %77 = vset.pattern.permute.xlu0 %v104_v4 }
  0x81   :  { %v21_v12 = vpop.permute.xlu0 %20  ;;  %v36_v13 = vpop.permute.xlu1 %35 }
  0x82   :  { %v27_v16 = vmul.f32 %v26_v11, %v21_v12  ;;  %v42_v18 = vmul.f32 %v41_v14, %v36_v13 }
  0x85   :  { %v31_v17 = vpop.permute.xlu0 %30 }
  0x86   :  { %v33_v19 = vadd.f32 %v31_v17, %v27_v16  ;;  %v46_v20 = vpop.permute.xlu1 %45 }
  0x87   :  { %v52_v21 = vmul.f32 %v51_v15, %v46_v20 }
  0x88   :  { %v43_v22 = vadd.f32 %v42_v18, %v33_v19 }
  0x8a   :  { %v53_v23 = vadd.f32 %v52_v21, %v43_v22 }
  0x8c   :  { %55 = vst.msk [vmem:[#allocation2] sm:$0xf] %vm54_vm0, %v53_v23 }
  0x8d   :  { %89 = shalt.err (!%p86_p4)
}
  0x8e   :  { %s90_s20 = scalar_lea.hbm %s150_s3, 64 }
  0x8f   :  { %p91_p5 = scmp.ne.s32.totalorder %s150_s3, %s90_s20  ;;  %p94_p6 = scmp.lt.u32.totalorder %s90_s20, %s150_s3 }
  0x91   :  { %p96_p7 = pnand %p94_p6, %p91_p5 }
  0x93   :  { %99 = shalt.err (!%p96_p7)
}
  0x94   :  { %65 = dma.vmem_to_hbm [thread:$0]  %s63_s17, 64, %s150_s3, [#allocation3]  }
  0x95   :  { %100 = dma.done.wait [#allocation3], 64  }
  0x96   :  { %101 = vsyncadd [#allocation3], 4294967232 }
  0x97   :  { %69 = vsyncpa [#allocation3], 1 }

</bundles_post_ra>
